<compile_context>
chip_gen: v7x
topology: tpu7x:2x2x1
jax: 0.10.0
libtpu: 0.0.40
codegen_flags: <defaults>
</compile_context>

<pallas_src>
import jax
import jax.numpy as jnp
from jax.experimental import pallas as pl
from jax.experimental.pallas import tpu as pltpu


def _attention_kernel(x_ref, w1_ref, b1_ref, w2_ref, b2_ref, o_ref):
    # x_ref:  (NB, C, TP)  input tile  (sublanes = channels, lanes = pixels)
    # w1_ref: (C8, C)      conv1 weight (1x1 conv == matmul over channels)
    # b1_ref: (C8, 1)      conv1 bias (f32)
    # w2_ref: (C8, 1)      conv2 weight column (single output channel, f32)
    # b2_ref: (1,)         conv2 bias scalar in SMEM (f32)
    # o_ref:  (NB, C, TP)  gated output tile
    nb = x_ref.shape[0]
    w1 = w1_ref[...]
    b1 = b1_ref[...]
    w2 = w2_ref[...]
    b2 = b2_ref[0]

    if nb == 1:
        x = x_ref[0]                                              # (C, TP) native dtype
        # conv1 (1x1) + relu: MXU matmul, f32 accumulation.
        h = jnp.dot(w1, x, preferred_element_type=jnp.float32)    # (C8, TP)
        h = jnp.maximum(h + b1, 0.0)
        # conv2 (out_channels == 1): VPU multiply + sublane reduce (no MXU).
        a = jnp.sum(h * w2, axis=0, keepdims=True) + b2           # (1, TP)
        a = jax.nn.sigmoid(a)
        # gate in the input dtype (bf16 stays bf16); broadcast over channels.
        o_ref[0] = (x * a.astype(x.dtype)).astype(o_ref.dtype)
    else:
        x = x_ref[...]                                            # (NB, C, TP)
        w1b = jnp.broadcast_to(w1[None], (nb,) + w1.shape)        # (NB, C8, C)
        h = jax.lax.dot_general(                                  # (NB, C8, TP)
            w1b, x, (((2,), (1,)), ((0,), (0,))),
            preferred_element_type=jnp.float32)
        h = jnp.maximum(h + b1[None], 0.0)
        a = jnp.sum(h * w2[None], axis=1, keepdims=True) + b2     # (NB, 1, TP)
        a = jax.nn.sigmoid(a)
        o_ref[...] = (x * a.astype(x.dtype)).astype(o_ref.dtype)


def _largest_divisor_leq(n, cap):
    cap = max(1, min(n, int(cap)))
    for d in range(cap, 0, -1):
        if n % d == 0:
            return d
    return 1


def _vmem_budget():
    """Scoped-VMEM limit and per-x-tile byte budget, generation-aware."""
    cap = 64 << 20
    try:
        info = pltpu.get_tpu_info()
        cap_q = int(getattr(info, "vmem_capacity_bytes", cap))
        if cap_q > 0:
            cap = cap_q
    except Exception:
        pass
    # v5e/v6e (128 MiB physical) -> 64 MiB scoped; v7x (64 MiB physical) -> 48 MiB.
    vmem_limit = int(min(cap * 3 // 4, 64 << 20))
    # Double-buffered x + o (4 tiles) take ~half the limit; the rest covers
    # weights, f32 intermediates (h, a) and compiler temporaries.
    x_tile_bytes = vmem_limit // 8
    return vmem_limit, x_tile_bytes


def _choose_tiling(N, C, HW, itemsize, x_tile_bytes):
    """Return (nb, tile_p, hw_pad): tiles are (nb, C, tile_p), pixel axis padded
    to hw_pad (tile_p always divides hw_pad)."""
    budget_px = max(1, x_tile_bytes // max(1, C * itemsize))      # nb * tile_p elems
    if HW <= budget_px:
        # Whole image(s) per tile; block over batch to amortize grid overhead,
        # but keep >= 2 programs when N >= 2 (v7x megacore).
        nb_cap = min(N, max(1, budget_px // HW))
        if N >= 2:
            nb_cap = min(nb_cap, max(1, N // 2))
        nb = _largest_divisor_leq(N, nb_cap)
        tile_p = HW
        if N == 1 and HW % 128 == 0 and HW >= 256:
            # Split the pixel axis instead so both TensorCores get work.
            m = HW // 128
            tile_p = 128 * _largest_divisor_leq(m, max(1, m // 2))
        return nb, tile_p, HW
    # Large feature map: split the pixel axis into big lane-dense tiles.
    budget_p = max(128, (budget_px // 128) * 128)
    hw_pad = ((HW + 127) // 128) * 128
    tile_p = 128 * _largest_divisor_leq(hw_pad // 128, budget_p // 128)
    if tile_p * 2 < budget_p:
        # No good 128-multiple divisor: pad further rather than use tiny tiles.
        tile_p = budget_p
        hw_pad = ((HW + tile_p - 1) // tile_p) * tile_p
    return 1, tile_p, hw_pad


def attention_module(x_nchw, w1, b1, w2, b2):
    """x_nchw: (N, C, H, W). w1: (C//8, C), b1: (C//8,), w2: (1, C//8), b2: (1,)."""
    N, C, H, W = x_nchw.shape
    C8 = w1.shape[0]
    HW = H * W
    itemsize = jnp.dtype(x_nchw.dtype).itemsize

    vmem_limit, x_tile_bytes = _vmem_budget()
    nb, tile_p, hw_pad = _choose_tiling(N, C, HW, itemsize, x_tile_bytes)

    # NCHW is already channel-major per image: reshape is free (no transpose).
    x3 = x_nchw.reshape(N, C, HW)
    if hw_pad != HW:
        x3 = jnp.pad(x3, ((0, 0), (0, 0), (0, hw_pad - HW)))

    # MXU operand follows the activation dtype (bf16 stays native);
    # biases / attention weights stay f32 (they feed the f32 accumulator path).
    w1_m = w1.astype(x_nchw.dtype)
    b1_c = b1.reshape(C8, 1).astype(jnp.float32)
    w2_c = w2.reshape(C8, 1).astype(jnp.float32)
    b2_s = b2.reshape(1).astype(jnp.float32)

    grid = (N // nb, hw_pad // tile_p)

    flops = int(2 * N * HW * C8 * C + 4 * N * HW * C8 + 4 * N * C * HW)
    bytes_accessed = int(2 * N * C * HW * itemsize + (C8 * C + 2 * C8 + 1) * 4)

    out3 = pl.pallas_call(
        _attention_kernel,
        out_shape=jax.ShapeDtypeStruct((N, C, hw_pad), x_nchw.dtype),
        grid_spec=pltpu.PrefetchScalarGridSpec(
            num_scalar_prefetch=0,
            grid=grid,
            in_specs=[
                pl.BlockSpec((nb, C, tile_p), lambda n, p: (n, 0, p)),  # x tile
                pl.BlockSpec((C8, C), lambda n, p: (0, 0)),             # w1 (resident)
                pl.BlockSpec((C8, 1), lambda n, p: (0, 0)),             # b1
                pl.BlockSpec((C8, 1), lambda n, p: (0, 0)),             # w2 column
                pl.BlockSpec(memory_space=pltpu.MemorySpace.SMEM),      # b2 scalar
            ],
            out_specs=pl.BlockSpec((nb, C, tile_p), lambda n, p: (n, 0, p)),
        ),
        compiler_params=pltpu.CompilerParams(
            dimension_semantics=("parallel", "parallel"),
            vmem_limit_bytes=vmem_limit),
        cost_estimate=pl.CostEstimate(
            flops=flops, transcendentals=int(N * HW),
            bytes_accessed=bytes_accessed),
    )(x3, w1_m, b1_c, w2_c, b2_s)

    if hw_pad != HW:
        out3 = out3[:, :, :HW]
    return out3.reshape(N, C, H, W)


def init_params(key, in_channels):
    """Mirror PyTorch module shapes: conv1 (C//8, C, 1, 1), conv2 (1, C//8, 1, 1),
    kaiming_normal(mode='fan_out', nonlinearity='relu'), zero biases."""
    c8 = in_channels // 8
    k1, k2 = jax.random.split(key, 2)
    std1 = (2.0 / (c8 * 1 * 1)) ** 0.5
    std2 = (2.0 / (1 * 1 * 1)) ** 0.5
    w1 = jax.random.normal(k1, (c8, in_channels), dtype=jnp.float32) * std1
    w2 = jax.random.normal(k2, (1, c8), dtype=jnp.float32) * std2
    b1 = jnp.zeros((c8,), dtype=jnp.float32)
    b2 = jnp.zeros((1,), dtype=jnp.float32)
    return w1, b1, w2, b2


def reference(x_nchw, w1, b1, w2, b2):
    # plain-JAX reference of the PyTorch forward
    xf = jnp.transpose(x_nchw, (0, 2, 3, 1))                      # NHWC
    h = jnp.maximum(jnp.einsum("nhwc,oc->nhwo", xf, w1) + b1, 0.0)
    a = jax.nn.sigmoid(jnp.einsum("nhwo,ko->nhwk", h, w2) + b2)   # (N,H,W,1)
    y = xf * a
    return jnp.transpose(y, (0, 3, 1, 2))


if __name__ == "__main__":
    key = jax.random.PRNGKey(0)
    kx, kp, kx2 = jax.random.split(key, 3)

    # Primary small example (in_channels must be divisible by 8).
    N, C, H, W = 2, 32, 16, 16
    x = jax.random.normal(kx, (N, C, H, W), dtype=jnp.float32)
    w1, b1, w2, b2 = init_params(kp, C)

    out = jax.block_until_ready(attention_module(x, w1, b1, w2, b2))
    ref = reference(x, w1, b1, w2, b2)
    assert out.shape == (N, C, H, W)
    assert jnp.allclose(out, ref, atol=1e-5, rtol=1e-5)

    # Second small shape that exercises the batch-blocked (nb > 1) tile path.
    N2, C2, H2, W2 = 8, 16, 8, 8
    x2 = jax.random.normal(kx2, (N2, C2, H2, W2), dtype=jnp.float32)
    w1b, b1b, w2b, b2b = init_params(kp, C2)
    out2 = jax.block_until_ready(attention_module(x2, w1b, b1b, w2b, b2b))
    ref2 = reference(x2, w1b, b1b, w2b, b2b)
    assert out2.shape == (N2, C2, H2, W2)
    assert jnp.allclose(out2, ref2, atol=1e-5, rtol=1e-5)

    print("KERNEL_OK")
</pallas_src>

<mosaic_0001>
module attributes {stable_mosaic.version = 11 : i64} {
  func.func @_attention_kernel(%arg0: i32, %arg1: i32, %arg2: memref<1x32x256xf32, #tpu.memory_space<vmem>>, %arg3: memref<4x32xf32, #tpu.memory_space<vmem>>, %arg4: memref<4x1xf32, #tpu.memory_space<vmem>>, %arg5: memref<4x1xf32, #tpu.memory_space<vmem>>, %arg6: memref<1xf32, #tpu.memory_space<smem>>, %arg7: memref<1x32x256xf32, #tpu.memory_space<vmem>>) attributes {dimension_semantics = [#tpu.dimension_semantics<parallel>, #tpu.dimension_semantics<parallel>], iteration_bounds = array<i64: 2, 1>, scalar_prefetch = 0 : i64, scratch_operands = 0 : i64, tpu.core_type = #tpu.core_type<tc>, window_params = [{transform_indices = @transform_0, window_bounds = array<i64: 1, 32, 256>}, {pipeline_mode = #tpu.pipeline_mode<synchronous>, transform_indices = @transform_1, window_bounds = array<i64: 4, 32>}, {pipeline_mode = #tpu.pipeline_mode<synchronous>, transform_indices = @transform_2, window_bounds = array<i64: 4, 1>}, {pipeline_mode = #tpu.pipeline_mode<synchronous>, transform_indices = @transform_3, window_bounds = array<i64: 4, 1>}, {transform_indices = @transform_4, window_bounds = array<i64: 1>}, {transform_indices = @transform_5, window_bounds = array<i64: 1, 32, 256>}]} {
    %c0 = arith.constant 0 : index
    %c0_0 = arith.constant 0 : index
    %0 = vector.load %arg3[%c0, %c0_0] : memref<4x32xf32, #tpu.memory_space<vmem>>, vector<4x32xf32>
    %c0_1 = arith.constant 0 : index
    %c0_2 = arith.constant 0 : index
    %1 = vector.load %arg4[%c0_1, %c0_2] : memref<4x1xf32, #tpu.memory_space<vmem>>, vector<4x1xf32>
    %c0_3 = arith.constant 0 : index
    %c0_4 = arith.constant 0 : index
    %2 = vector.load %arg5[%c0_3, %c0_4] : memref<4x1xf32, #tpu.memory_space<vmem>>, vector<4x1xf32>
    %c0_5 = arith.constant 0 : index
    %3 = memref.load %arg6[%c0_5] : memref<1xf32, #tpu.memory_space<smem>>
    %c0_6 = arith.constant 0 : index
    %c0_7 = arith.constant 0 : index
    %c0_8 = arith.constant 0 : index
    %4 = vector.load %arg2[%c0_6, %c0_7, %c0_8] : memref<1x32x256xf32, #tpu.memory_space<vmem>>, vector<1x32x256xf32>
    %5 = vector.shape_cast %4 : vector<1x32x256xf32> to vector<32x256xf32>
    %cst = arith.constant dense<0.000000e+00> : vector<4x256xf32>
    %6 = tpu.matmul %0, %5, %cst {dimension_numbers = #tpu.dot_dimension_numbers<[1], [0], [0], [1], [0, 0, 1, 1], [], []>} : vector<4x32xf32>, vector<32x256xf32>, vector<4x256xf32> -> vector<4x256xf32>
    %7 = vector.broadcast %1 : vector<4x1xf32> to vector<4x256xf32>
    %8 = arith.addf %6, %7 : vector<4x256xf32>
    %cst_9 = arith.constant 0.000000e+00 : f32
    %9 = vector.broadcast %cst_9 : f32 to vector<4x256xf32>
    %10 = arith.maximumf %8, %9 : vector<4x256xf32>
    %11 = vector.broadcast %2 : vector<4x1xf32> to vector<4x256xf32>
    %12 = arith.mulf %10, %11 : vector<4x256xf32>
    %cst_10 = arith.constant dense<0.000000e+00> : vector<256xf32>
    %13 = vector.multi_reduction <add>, %12, %cst_10 [0] : vector<4x256xf32> to vector<256xf32>
    %14 = vector.shape_cast %13 : vector<256xf32> to vector<1x256xf32>
    %15 = vector.broadcast %3 : f32 to vector<1x256xf32>
    %16 = arith.addf %14, %15 : vector<1x256xf32>
    %17 = arith.negf %16 : vector<1x256xf32>
    %18 = math.exp %17 : vector<1x256xf32>
    %cst_11 = arith.constant 1.000000e+00 : f32
    %19 = vector.broadcast %cst_11 : f32 to vector<1x256xf32>
    %20 = arith.addf %19, %18 : vector<1x256xf32>
    %21 = arith.divf %19, %20 : vector<1x256xf32>
    %22 = vector.broadcast %21 : vector<1x256xf32> to vector<32x256xf32>
    %23 = arith.mulf %5, %22 : vector<32x256xf32>
    %c0_12 = arith.constant 0 : index
    %c0_13 = arith.constant 0 : index
    %c0_14 = arith.constant 0 : index
    %24 = vector.load %arg7[%c0_12, %c0_13, %c0_14] : memref<1x32x256xf32, #tpu.memory_space<vmem>>, vector<1x32x256xf32>
    %25 = vector.shape_cast %24 : vector<1x32x256xf32> to vector<32x256xf32>
    %26 = vector.shape_cast %23 : vector<32x256xf32> to vector<1x32x256xf32>
    tpu.vector_store %arg7[%c0_12, %c0_13, %c0_14], %26 {strides = array<i32>} : memref<1x32x256xf32, #tpu.memory_space<vmem>>, vector<1x32x256xf32>,
    return
  }
  func.func @transform_0(%arg0: i32, %arg1: i32) -> (i32, i32, i32) {
    %c0_i32 = arith.constant 0 : i32
    %c0_i32_0 = arith.constant 0 : i32
    return %arg0, %c0_i32, %arg1 : i32, i32, i32
  }
  func.func @transform_1(%arg0: i32, %arg1: i32) -> (i32, i32) {
    %c0_i32 = arith.constant 0 : i32
    %c0_i32_0 = arith.constant 0 : i32
    %c0_i32_1 = arith.constant 0 : i32
    return %c0_i32, %c0_i32_0 : i32, i32
  }
  func.func @transform_2(%arg0: i32, %arg1: i32) -> (i32, i32) {
    %c0_i32 = arith.constant 0 : i32
    %c0_i32_0 = arith.constant 0 : i32
    %c0_i32_1 = arith.constant 0 : i32
    return %c0_i32, %c0_i32_0 : i32, i32
  }
  func.func @transform_3(%arg0: i32, %arg1: i32) -> (i32, i32) {
    %c0_i32 = arith.constant 0 : i32
    %c0_i32_0 = arith.constant 0 : i32
    %c0_i32_1 = arith.constant 0 : i32
    return %c0_i32, %c0_i32_0 : i32, i32
  }
  func.func @transform_4(%arg0: i32, %arg1: i32) -> i32 {
    %c0_i32 = arith.constant 0 : i32
    %c0_i32_0 = arith.constant 0 : i32
    return %c0_i32 : i32
  }
  func.func @transform_5(%arg0: i32, %arg1: i32) -> (i32, i32, i32) {
    %c0_i32 = arith.constant 0 : i32
    %c0_i32_0 = arith.constant 0 : i32
    return %arg0, %c0_i32, %arg1 : i32, i32, i32
  }
}

</mosaic_0001>

<bundles_post_ra>
// kernel: tpu_custom_call.1
= control target key start
LH: loop header
LB: loop body
LE: loop exit
PB: predicated region body
PF: predicated region fallthrough
CT: control target
= control target key end

     0   :  { %s986_s0 = inlined_call_operand.hbm [shape: f32[2,32,256], index: 0, kind: input, shape index: {}]   ;;  %s987_s1 = inlined_call_operand.vmem [shape: f32[4,32], index: 1, kind: input, shape index: {}]   ;;  %s988_s2 = inlined_call_operand.vmem [shape: f32[4,1], index: 2, kind: input, shape index: {}]   ;;  %s989_s3 = inlined_call_operand.vmem [shape: f32[4,1], index: 3, kind: input, shape index: {}]   ;;  %s990_s4 = inlined_call_operand.<no memory space> [shape: f32[1], index: 4, kind: input, shape index: {}]   ;;  %s991_s5 = inlined_call_operand.hbm [shape: f32[2,32,256], index: 5, kind: output, shape index: {}]  }
   0x1   :  { %10 = sst [smem:[#allocation2]] %s990_s4 }
   0x2   :  { %11 = vsyncpa [#allocation4], 0 }
   0x3   :  { %13 = vsyncpa [#allocation4 + $0x1], 0 }
   0x4   :  { %14 = vsyncpa [#allocation5], 0 }
   0x5   :  { %16 = vsyncpa [#allocation5 + $0x1], 0  ;;  %s774_s20 = smov 0   ;;  %s776_s21 = smov 0  }
   0x6   :  { %s778_s22 = smov 0   ;;  %s780_s23 = smov 0  }
   0x7   :  { %s782_s24 = smov 0   ;;  %s784_s25 = smov 0  }
   0x8 LB: > { %s514_s4 = sadd.s32 4294967295, %s731_s25   ;;  %s515_s26 = sadd.s32 4294967294, %s731_s25   ;;  %s731_s25 = sphi %s784_s25, %s22_s25   ;;  %s727_s24 = sphi %s782_s24, %s1006_s24   ;;  %s723_s23 = sphi %s780_s23, %s1005_s23   ;;  %s719_s22 = sphi %s778_s22, %s1004_s22   ;;  %s715_s21 = sphi %s776_s21, %s1003_s21   ;;  %s711_s20 = sphi %s774_s20, %s1002_s20  }
   0x9   : > { %s34_s27 = sadd.s32 1, %s727_s24  ;;  %s43_s28 = sadd.s32 1, %s719_s22 }
   0xa   : > { %p36_p0 = scmp.ge.s32.totalorder %s34_s27, 2  ;;  %p50_p1 = scmp.ne.s32.totalorder %s719_s22, %s715_s21 }
   0xb   : > { %p51_p2 = scmp.eq.s32.totalorder %s731_s25, 0  ;;  %p56_p3 = scmp.ne.s32.totalorder %s715_s21, %s711_s20 }
   0xc   : > { %s1008_s27 = smov (%p36_p0, %s34_s27), 0  ;;  %p57_p5 = scmp.eq.s32.totalorder %s514_s4, 0 }
   0xd   : > { %p815_p4 = por %p51_p2, %p50_p1  ;;  %s38_s30 = ssub.s32 %s727_s24, %s1008_s27 }
   0xe   : > { %p166_p6 = scmp.eq.s32.totalorder %s514_s4, 1  ;;  %p41_p7 = scmp.eq.s32.totalorder %s38_s30, 0 }
   0xf   : > { %p821_p8 = por %p57_p5, %p56_p3  ;;  %p172_p10 = scmp.eq.s32.totalorder %s515_s26, 1 }
  0x10   : > { %p825_p9 = por %p166_p6, %p50_p1  ;;  %p554_p13 = scmp.lt.s32.totalorder %s731_s25, 2 }
  0x11   : > { %s830_s8 = scalar_select %p41_p7, %s719_s22, %s43_s28  }
  0x12   : > { %s995_s7 = scalar_select %p825_p9, 1, 0 }
  0x13   : > { %p832_p11 = por %p172_p10, %p56_p3  ;;  %s204_s10 = sand.u32 1, %s719_s22  }
  0x14   : > { %s518_s11 = sshll.u32 %s204_s10, 6  ;;  %s532_s12 = sshll.u32 %s727_s24, 10 }
  0x15   : > { %s996_s9 = scalar_select %p832_p11, 1, 0 }
  0x16   : > { %s843_s15 = scalar_lea.hbm %s986_s0, %s532_s12  ;;  %s208_s16 = scalar_lea.vmem [#allocation3], %s518_s11 }
  0x17   : > { %s217_s17 = sshll.u32 %s208_s16, 4  ;;  %p849_p0 = pnand %p554_p13, %p815_p4  ;;  %s845_s17 = int_to_ptr.vmem [resolvable:$true] %s217_s17 }
  0x18   : > { %s854_s19 = scalar_lea.sflag [#allocation4], %s204_s10  ;;  %s619_s4 = scalar_lea.hbm %s843_s15, 1024 }
  0x19   : > { %p620_p2 = scmp.ne.s32.totalorder %s843_s15, %s619_s4  ;;  %p621_p3 = pneg %p849_p0 }
  0x1a   : > { %s624_s29 = scalar_lea.hbm %s986_s0, 2048  ;;  %p625_p4 = scmp.lt.u32.totalorder %s843_s15, %s986_s0 }
  0x1b   : > { %p622_p5 = pnand %p621_p3, %p620_p2  ;;  %p626_p7 = scmp.lt.u32.totalorder %s624_s29, %s619_s4 }
  0x1c   : > { %p628_p13 = scmp.lt.u32.totalorder %s619_s4, %s843_s15 }
  0x1d   : > { %p623_p6 = pneg %p622_p5  ;;  %p627_p10 = por %p626_p7, %p625_p4 }
  0x1f   : > { %p629_p12 = por %p628_p13, %p627_p10 }
  0x21   : > { %p630_p1 = pnand %p629_p12, %p623_p6 }
  0x23   : > { %633 = shalt.err (!%p630_p1)
}
  0x24   : > { %s634_s10 = scalar_lea.vmem %s845_s17, 1024  ;;  %s733_s12 = smov [#allocation3]  }
  0x25   : > { %p635_p2 = scmp.ne.s32.totalorder %s845_s17, %s634_s10  ;;  %s639_s13 = sshll.u32 %s733_s12, 4  ;;  %s640_s13 = int_to_ptr.vmem [resolvable:$false] %s639_s13 }
  0x26   : > { %s641_s14 = scalar_lea.vmem %s640_s13, 2048  ;;  %p642_p9 = scmp.lt.s32.totalorder %s845_s17, %s640_s13 }
  0x27   : > { %p637_p5 = pnand %p635_p2, %p621_p3  ;;  %p643_p4 = scmp.lt.s32.totalorder %s641_s14, %s634_s10 }
  0x29   : > { %p638_p11 = pneg %p637_p5  ;;  %p644_p7 = por %p643_p4, %p642_p9 }
  0x2b   : > { %p645_p10 = pnand %p644_p7, %p638_p11 }
  0x2d   : > { %648 = shalt.err (!%p645_p10)
}
  0x2e   : > { %s734_s16 = smov 256   ;;  %s735_s4 = smov 16  }
  0x2f   : > { %549 = dma.hbm_to_vmem [thread:$0]  (!%p849_p0), %s843_s15, 1024, %s845_s17, %s854_s19, %s734_s16, %s734_s16, %s735_s4  }
  0x30   : > { %p225_p12 = scmp.lt.s32.totalorder %s731_s25, 3  ;;  %p998_p1 = scmp.ge.s32.totalorder %s731_s25, 1 }
  0x32   : > { %p226_p3 = pnand %p998_p1, %p225_p12 }
  0x33   : > { %s886_s26 = sand.u32 (!%p226_p3), 1, %s715_s21  }
  0x34   : > { %229 = sbr.rel (%p226_p3) target bundleno = 350 (0x15e), region = 40  ;;  %s522_s28 = sshll.u32 (!%p226_p3), %s886_s26, 6 }
  0x35   : > { %s232_s29 = scalar_lea.sflag (!%p226_p3), [#allocation4], %s886_s26  ;;  %s235_s30 = scalar_lea.vmem (!%p226_p3), [#allocation3], %s522_s28 }
  0x3b   : > { %702 = dma.done.wait (%p821_p8), %s232_s29, 1024  }
  0x3c   : > { %704 = vsyncadd (%p821_p8), %s232_s29, 4294966272  ;;  %v736_v0 = vmov 0.0   ;;  %v737_v1 = vmov 0   ;;  %v896_v2 = vld [vmem:[%s235_s30 + $0x8] sm:$0xff]  ;;  %v898_v3 = vld [vmem:[%s235_s30 + $0x18] sm:$0xff]  ;;  %vm281_vm0 = vcmask 261120  }
  0x3d   : > { %349 = vmatprep.mubr.f32.mxu0 %v736_v0  ;;  %610 = vset.pattern.permute.xlu0 %v737_v1  ;;  %v900_v4 = vld [vmem:[%s235_s30] sm:$0xff]  ;;  %v534_v5 = vpack.c.bf16 %v898_v3, %v896_v2  ;;  %v904_v6 = vld [vmem:[%s235_s30 + $0x10] sm:$0xff]  ;;  %v906_v7 = vld [vmem:[%s235_s30 + $0x28] sm:$0xff]  ;;  %vm365_vm1 = vcmask 1043456   ;;  %s267_s10 = sld [smem:[#allocation2]]  ;;  %s533_s12 = sshll.u32 %s723_s23, 10 }
  0x3e   : > { %v908_v8 = vld [vmem:[%s235_s30 + $0x38] sm:$0xff]  ;;  %v536_v9 = vpack.c.bf16 %v904_v6, %v900_v4  ;;  %v272_v11 = vld [vmem:[%s235_s30 + $0x20] sm:$0xff]  ;;  %v274_v12 = vld [vmem:[%s235_s30 + $0x30] sm:$0xff]  ;;  %s261_s13 = scalar_lea.vmem [#allocation6], %s522_s28  ;;  %s931_s29 = scalar_lea.hbm %s991_s5, %s533_s12 }
  0x3f   : > { %v538_v10 = vpack.c.bf16 %v908_v8, %v906_v7  ;;  %535 = vmatprep.subr.bf16.mxu0 %v534_v5  ;;  %v265_v13 = vld [vmem:[%s988_s2] sm:$0xf]  ;;  %v540_v14 = vpack.c.bf16 %v274_v12, %v272_v11  ;;  %s427_s14 = sshll.u32 %s261_s13, 4  ;;  %s412_s23 = scalar_lea.sflag [#allocation5], %s886_s26  ;;  %s933_s14 = int_to_ptr.vmem [resolvable:$true] %s427_s14 }
  0x40   : > { %537 = vmatpush1.bf16.msra.mxu0 %v536_v9  ;;  %278 = vperm.xlu0 %610, %v265_v13   ;;  %v266_v15 = vld [vmem:[%s989_s3] sm:$0xf]  ;;  %s649_s28 = scalar_lea.vmem %s933_s14, 1024  ;;  %p999_p9 = scmp.ne.s32.totalorder %s995_s7, 0 }
  0x41   : > { %539 = vmatprep.subr.bf16.mxu0 %v538_v10  ;;  %v264_v16 = vld [vmem:[%s987_s1] sm:$0xf]  ;;  %p650_p8 = scmp.ne.s32.totalorder %s933_s14, %s649_s28  ;;  %s738_s30 = smov [#allocation6]  }
  0x42   : > { %s653_s6 = sshll.u32 %s738_s30, 4  ;;  %s654_s6 = int_to_ptr.vmem [resolvable:$false] %s653_s6 }
  0x43   : > { %v380_v38 = vstv %s267_s10  ;;  %p651_p11 = pnand %p650_p8, %p999_p9  ;;  %s655_s15 = scalar_lea.vmem %s654_s6, 2048 }
  0x44   : > { %541 = vmatpush1.bf16.msra.mxu0 %v540_v14  ;;  %360 = vperm.xlu0 %610, %v266_v15   ;;  %p656_p6 = scmp.lt.s32.totalorder %s933_s14, %s654_s6  ;;  %p657_p13 = scmp.lt.s32.totalorder %s655_s15, %s649_s28 }
  0x45   : > { %p652_p0 = pneg %p651_p11 }
  0x46   : > { %p658_p2 = por %p657_p13, %p656_p6 }
  0x47   : > { %524 = vmatmul.mubr.msk.f32.vlgmr.msra.gmra.mrb[0].mxu0 %vm281_vm0, %v264_v16 }
  0x48   : > { %p659_p5 = pnand %p658_p2, %p652_p0 }
  0xbf   : > { %v279_v17 = vpop.permute.xlu0 %278 }
  0xc3   : > { %v361_v23 = vpop.permute.xlu0 %360 }
 0x11a   : > { %v351_v18 = vpop.f32.mrb[0].mxu0 }
 0x11b   : > { %v352_v19 = vadd.f32 %v351_v18, %v279_v17  ;;  %v353_v20 = vpop.f32.mrb[1].mxu0 }
 0x11c   : > { %v354_v21 = vadd.f32 %v353_v20, %v279_v17 }
 0x11d   : > { %v356_v22 = vmax.f32 %v352_v19, 0.0 }
 0x11e   : > { %v357_v24 = vmax.f32 %v354_v21, 0.0 }
 0x11f   : > { %v363_v25 = vmul.f32 %v361_v23, %v356_v22 }
 0x120   : > { %v364_v26 = vmul.f32 %v361_v23, %v357_v24 }
 0x121   : > { %v366_v27 = vsel %vm365_vm1, %v363_v25, 0.0 }
 0x122   : > { %v367_v28 = vrot.slane %v366_v27, 4  ;;  %v373_v29 = vsel %vm365_vm1, %v364_v26, 0.0 }
 0x123   : > { %v374_v30 = vrot.slane %v373_v29, 4 }
 0x124   : > { %v368_v31 = vadd.f32 %v367_v28, %v366_v27 }
 0x125   : > { %v375_v32 = vadd.f32 %v374_v30, %v373_v29 }
 0x126   : > { %v369_v33 = vrot.slane %v368_v31, 2 }
 0x127   : > { %v376_v34 = vrot.slane %v375_v32, 2 }
 0x128   : > { %v370_v35 = vadd.f32 %v369_v33, %v368_v31 }
 0x129   : > { %v377_v36 = vadd.f32 %v376_v34, %v375_v32 }
 0x12a   : > { %v371_v37 = vrot.slane %v370_v35, 1 }
 0x12b   : > { %v378_v39 = vrot.slane %v377_v36, 1 }
 0x12c   : > { %v372_v40 = vadd.f32 %v371_v37, %v370_v35 }
 0x12d   : > { %v379_v41 = vadd.f32 %v378_v39, %v377_v36 }
 0x12e   : > { %v381_v42 = vadd.f32 %v380_v38, %v372_v40 }
 0x12f   : > { %v382_v43 = vadd.f32 %v380_v38, %v379_v41 }
 0x130   : > { %v525_v44 = vmul.f32 -1.442695, %v381_v42 }
 0x131   : > { %v526_v45 = vmul.f32 -1.442695, %v382_v43 }
 0x132   : > { %611 = vpow2.f32 %v525_v44 }
 0x133   : > { %613 = vpow2.f32 %v526_v45 }
 0x13c   : > { %v612_v46 = vpop.eup %611 }
 0x13d   : > { %v614_v47 = vpop.eup %613  ;;  %v389_v48 = vadd.f32 1.0, %v612_v46 }
 0x13e   : > { %v390_v49 = vadd.f32 1.0, %v614_v47 }
 0x13f   : > { %615 = vrcp.f32 %v389_v48 }
 0x140   : > { %617 = vrcp.f32 %v390_v49 }
 0x149   : > { %v616_v50 = vpop.eup %615 }
 0x14a   : > { %v618_v51 = vpop.eup %617  ;;  %v395_v52 = vmul.f32 %v616_v50, %v900_v4  ;;  %v397_v53 = vmul.f32 %v616_v50, %v904_v6  ;;  %v399_v54 = vmul.f32 %v616_v50, %v272_v11  ;;  %v401_v55 = vmul.f32 %v616_v50, %v274_v12 }
 0x14b   : > { %v396_v56 = vmul.f32 %v618_v51, %v896_v2  ;;  %v398_v57 = vmul.f32 %v618_v51, %v898_v3  ;;  %v400_v58 = vmul.f32 %v618_v51, %v906_v7  ;;  %v402_v59 = vmul.f32 %v618_v51, %v908_v8 }
 0x14c   : > { %403 = vst [vmem:[%s261_s13] sm:$0xff] %v395_v52  ;;  %405 = vst [vmem:[%s261_s13 + $0x10] sm:$0xff] %v397_v53 }
 0x14d   : > { %407 = vst [vmem:[%s261_s13 + $0x20] sm:$0xff] %v399_v54  ;;  %409 = vst [vmem:[%s261_s13 + $0x30] sm:$0xff] %v401_v55 }
 0x14e   : > { %404 = vst [vmem:[%s261_s13 + $0x8] sm:$0xff] %v396_v56  ;;  %406 = vst [vmem:[%s261_s13 + $0x18] sm:$0xff] %v398_v57 }
 0x14f   : > { %408 = vst [vmem:[%s261_s13 + $0x28] sm:$0xff] %v400_v58  ;;  %410 = vst [vmem:[%s261_s13 + $0x38] sm:$0xff] %v402_v59 }
 0x150   : > { %662 = shalt.err (!%p659_p5)
}
 0x151   : > { %s663_s17 = scalar_lea.hbm %s931_s29, 1024  ;;  %s667_s11 = scalar_lea.hbm %s991_s5, 2048 }
 0x152   : > { %p664_p4 = scmp.ne.s32.totalorder %s931_s29, %s663_s17  ;;  %p668_p12 = scmp.lt.u32.totalorder %s931_s29, %s991_s5 }
 0x153   : > { %p669_p1 = scmp.lt.u32.totalorder %s667_s11, %s663_s17  ;;  %p671_p8 = scmp.lt.u32.totalorder %s663_s17, %s931_s29 }
 0x154   : > { %p665_p7 = pnand %p664_p4, %p999_p9 }
 0x155   : > { %p670_p3 = por %p669_p1, %p668_p12 }
 0x156   : > { %p666_p10 = pneg %p665_p7 }
 0x157   : > { %p672_p11 = por %p671_p8, %p670_p3 }
 0x159   : > { %p673_p0 = pnand %p672_p11, %p666_p10 }
 0x15b   : > { %676 = shalt.err (!%p673_p0)
}
 0x15c   : > { %s739_s13 = smov 256   ;;  %s740_s16 = smov 16  }
 0x15d   : > { %544 = dma.vmem_to_hbm [thread:$0]  (%p999_p9), %s933_s14, 1024, %s931_s29, %s412_s23, %s739_s13, %s739_s13, %s740_s16  }
 0x15e PF: > { %s442_s4 = sand.u32 1, %s711_s20   ;;  %p1000_p6 = scmp.ne.s32.totalorder %s996_s9, 0 }
 0x15f   : > { %p1001_p13 = scmp.ge.s32.totalorder %s731_s25, 2  ;;  %s443_s28 = scalar_lea.sflag [#allocation5], %s442_s4 }
 0x161   : > { %p551_p2 = pnand %p1001_p13, %p1000_p6 }
 0x163   : > { %706 = dma.done.wait (!%p551_p2), %s443_s28, 1024  }
 0x164   : > { %708 = vsyncadd (!%p551_p2), %s443_s28, 4294966272  ;;  %s22_s25 = sadd.s32 1, %s731_s25   ;;  %s1002_s20 = smov %s715_s21 }
 0x165   : > { %p19_p5 = scmp.ge.s32.totalorder %s22_s25, 4   ;;  %s1003_s21 = smov %s719_s22 }
 0x166   : > { %s1004_s22 = smov %s830_s8  ;;  %s1005_s23 = smov %s727_s24 }
 0x167   : > { %s1006_s24 = smov %s1008_s27  ;;  %21 = sbr.rel (!%p19_p5) target bundleno = 8 (0x8), region = 85 }
 0x16e   :  { %448 = vsyncpa [#allocation4], 1 }
 0x16f   :  { %450 = vsyncpa [#allocation4 + $0x1], 1 }
 0x170   :  { %451 = vsyncpa [#allocation5], 1 }
 0x171   :  { %453 = vsyncpa [#allocation5 + $0x1], 1 }

</bundles_post_ra>
